<compile_context>
chip_gen: v5e
topology: v5e:2x2
jax: 0.10.0
libtpu: 0.0.40
codegen_flags: <defaults>
</compile_context>

<pallas_src>
import jax
import jax.numpy as jnp
from jax.experimental import pallas as pl
from jax.experimental.pallas import tpu as pltpu


def _conv1x1_kernel(x_ref, w_ref, b_ref, o_ref):
    # x_ref: (B_TILE, C_in, TL), w_ref: (C_out, C_in), b_ref: (C_out, 1),
    # o_ref: (B_TILE, C_out, TL).  B_TILE is small and static -> unrolled loop.
    w = w_ref[...]
    b = b_ref[...]
    for i in range(x_ref.shape[0]):
        acc = jnp.dot(w, x_ref[i], preferred_element_type=jnp.float32)
        o_ref[i] = (acc + b).astype(o_ref.dtype)


def _pick_tl(length_padded):
    # length_padded is a multiple of 128; pick the largest lane-dense tile.
    for tl in (4096, 2048, 1024, 512, 256, 128):
        if length_padded % tl == 0:
            return tl
    return 128  # unreachable (128 always divides), kept for safety


def _pick_bt(n):
    # Batches per grid step in the small-L regime.
    for bt in (16, 8, 4, 2, 1):
        if n % bt == 0:
            return bt
    return 1


def conv1d_1x1(x, weight, bias):
    """x: (N, C_in, L) f32; weight: (C_out, C_in); bias: (C_out,) -> (N, C_out, L)."""
    n, c_in, length = x.shape
    c_out, c_in_w = weight.shape
    assert c_in == c_in_w, "channel mismatch"

    if length >= 128:
        # Pad L to a multiple of 128 so every tile is lane-dense and the
        # per-block VMEM footprint is bounded (no giant full-L fallback).
        l_pad = ((length + 127) // 128) * 128
        if l_pad != length:
            x = jnp.pad(x, ((0, 0), (0, 0), (0, l_pad - length)))
        tl = _pick_tl(l_pad)
        b_tile = 1
    else:
        # Small-L regime: keep L as the full (legal) last dim and pack
        # several batches into each grid step to amortize per-step overhead.
        l_pad = length
        tl = length
        b_tile = _pick_bt(n)

    n_l_tiles = l_pad // tl
    n_b_tiles = n // b_tile

    b2d = bias.reshape(c_out, 1)  # 2D so the bias broadcasts along lanes

    m = n * l_pad
    cost = pl.CostEstimate(
        flops=2 * m * c_in * c_out,
        transcendentals=0,
        bytes_accessed=4 * (m * c_in + c_in * c_out + c_out + m * c_out),
    )

    out = pl.pallas_call(
        _conv1x1_kernel,
        out_shape=jax.ShapeDtypeStruct((n, c_out, l_pad), x.dtype),
        grid_spec=pltpu.PrefetchScalarGridSpec(
            num_scalar_prefetch=0,
            grid=(n_b_tiles, n_l_tiles),
            in_specs=[
                # per-(batch-tile, L-tile) activation slab
                pl.BlockSpec((b_tile, c_in, tl), lambda b, l: (b, 0, l)),
                # weight & bias stay resident in VMEM across all grid steps
                pl.BlockSpec((c_out, c_in), lambda b, l: (0, 0)),
                pl.BlockSpec((c_out, 1), lambda b, l: (0, 0)),
            ],
            out_specs=pl.BlockSpec((b_tile, c_out, tl), lambda b, l: (b, 0, l)),
        ),
        compiler_params=pltpu.CompilerParams(
            dimension_semantics=("parallel", "parallel")),
        cost_estimate=cost,
    )(x, weight, b2d)

    if l_pad != length:
        out = out[:, :, :length]
    return out


if __name__ == "__main__":
    key = jax.random.PRNGKey(0)
    k_x, k_w, k_b, k_x2 = jax.random.split(key, 4)

    N, C_IN, C_OUT, L = 2, 96, 192, 16

    # deterministic parameter init (PyTorch-style uniform bound = 1/sqrt(fan_in))
    bound = 1.0 / (C_IN ** 0.5)
    weight = jax.random.uniform(k_w, (C_OUT, C_IN), jnp.float32, -bound, bound)
    bias = jax.random.uniform(k_b, (C_OUT,), jnp.float32, -bound, bound)

    # --- small-L path (the module's test shape) ---
    x = jax.random.normal(k_x, (N, C_IN, L), jnp.float32)
    out = conv1d_1x1(x, weight, bias)
    jax.block_until_ready(out)
    ref = jnp.einsum("ncl,oc->nol", x, weight) + bias[None, :, None]
    assert out.shape == (N, C_OUT, L)
    assert jnp.allclose(out, ref, atol=1e-4, rtol=1e-4)

    # --- lane-dense / padded-L path (ragged L -> padded to 256, sliced back) ---
    L2 = 200
    x2 = jax.random.normal(k_x2, (N, C_IN, L2), jnp.float32)
    out2 = conv1d_1x1(x2, weight, bias)
    jax.block_until_ready(out2)
    ref2 = jnp.einsum("ncl,oc->nol", x2, weight) + bias[None, :, None]
    assert out2.shape == (N, C_OUT, L2)
    assert jnp.allclose(out2, ref2, atol=1e-4, rtol=1e-4)

    print("KERNEL_OK")
</pallas_src>

<mosaic_0001>
module attributes {stable_mosaic.version = 11 : i64} {
  func.func @_conv1x1_kernel(%arg0: i32, %arg1: i32, %arg2: memref<2x96x16xf32, #tpu.memory_space<vmem>>, %arg3: memref<192x96xf32, #tpu.memory_space<vmem>>, %arg4: memref<192x1xf32, #tpu.memory_space<vmem>>, %arg5: memref<2x192x16xf32, #tpu.memory_space<vmem>>) attributes {dimension_semantics = [#tpu.dimension_semantics<parallel>, #tpu.dimension_semantics<parallel>], iteration_bounds = array<i64: 1, 1>, scalar_prefetch = 0 : i64, scratch_operands = 0 : i64, tpu.core_type = #tpu.core_type<tc>, window_params = [{transform_indices = @transform_0, window_bounds = array<i64: 2, 96, 16>}, {pipeline_mode = #tpu.pipeline_mode<synchronous>, transform_indices = @transform_1, window_bounds = array<i64: 192, 96>}, {pipeline_mode = #tpu.pipeline_mode<synchronous>, transform_indices = @transform_2, window_bounds = array<i64: 192, 1>}, {transform_indices = @transform_3, window_bounds = array<i64: 2, 192, 16>}]} {
    %c0 = arith.constant 0 : index
    %c0_0 = arith.constant 0 : index
    %0 = vector.load %arg3[%c0, %c0_0] : memref<192x96xf32, #tpu.memory_space<vmem>>, vector<192x96xf32>
    %c0_1 = arith.constant 0 : index
    %c0_2 = arith.constant 0 : index
    %1 = vector.load %arg4[%c0_1, %c0_2] : memref<192x1xf32, #tpu.memory_space<vmem>>, vector<192x1xf32>
    %c0_3 = arith.constant 0 : index
    %c0_4 = arith.constant 0 : index
    %c0_5 = arith.constant 0 : index
    %2 = vector.load %arg2[%c0_3, %c0_4, %c0_5] : memref<2x96x16xf32, #tpu.memory_space<vmem>>, vector<1x96x16xf32>
    %3 = vector.shape_cast %2 : vector<1x96x16xf32> to vector<96x16xf32>
    %cst = arith.constant dense<0.000000e+00> : vector<192x16xf32>
    %4 = tpu.matmul %0, %3, %cst {dimension_numbers = #tpu.dot_dimension_numbers<[1], [0], [0], [1], [0, 0, 1, 1], [], []>} : vector<192x96xf32>, vector<96x16xf32>, vector<192x16xf32> -> vector<192x16xf32>
    %5 = vector.broadcast %1 : vector<192x1xf32> to vector<192x16xf32>
    %6 = arith.addf %4, %5 : vector<192x16xf32>
    %c0_6 = arith.constant 0 : index
    %c0_7 = arith.constant 0 : index
    %c0_8 = arith.constant 0 : index
    %7 = vector.load %arg5[%c0_6, %c0_7, %c0_8] : memref<2x192x16xf32, #tpu.memory_space<vmem>>, vector<1x192x16xf32>
    %8 = vector.shape_cast %7 : vector<1x192x16xf32> to vector<192x16xf32>
    %9 = vector.shape_cast %6 : vector<192x16xf32> to vector<1x192x16xf32>
    tpu.vector_store %arg5[%c0_6, %c0_7, %c0_8], %9 {strides = array<i32>} : memref<2x192x16xf32, #tpu.memory_space<vmem>>, vector<1x192x16xf32>,
    %c1 = arith.constant 1 : index
    %c0_9 = arith.constant 0 : index
    %c0_10 = arith.constant 0 : index
    %10 = vector.load %arg2[%c1, %c0_9, %c0_10] : memref<2x96x16xf32, #tpu.memory_space<vmem>>, vector<1x96x16xf32>
    %11 = vector.shape_cast %10 : vector<1x96x16xf32> to vector<96x16xf32>
    %cst_11 = arith.constant dense<0.000000e+00> : vector<192x16xf32>
    %12 = tpu.matmul %0, %11, %cst_11 {dimension_numbers = #tpu.dot_dimension_numbers<[1], [0], [0], [1], [0, 0, 1, 1], [], []>} : vector<192x96xf32>, vector<96x16xf32>, vector<192x16xf32> -> vector<192x16xf32>
    %13 = vector.broadcast %1 : vector<192x1xf32> to vector<192x16xf32>
    %14 = arith.addf %12, %13 : vector<192x16xf32>
    %c1_12 = arith.constant 1 : index
    %c0_13 = arith.constant 0 : index
    %c0_14 = arith.constant 0 : index
    %15 = vector.load %arg5[%c1_12, %c0_13, %c0_14] : memref<2x192x16xf32, #tpu.memory_space<vmem>>, vector<1x192x16xf32>
    %16 = vector.shape_cast %15 : vector<1x192x16xf32> to vector<192x16xf32>
    %17 = vector.shape_cast %14 : vector<192x16xf32> to vector<1x192x16xf32>
    tpu.vector_store %arg5[%c1_12, %c0_13, %c0_14], %17 {strides = array<i32>} : memref<2x192x16xf32, #tpu.memory_space<vmem>>, vector<1x192x16xf32>,
    return
  }
  func.func @transform_0(%arg0: i32, %arg1: i32) -> (i32, i32, i32) {
    %c0_i32 = arith.constant 0 : i32
    %c0_i32_0 = arith.constant 0 : i32
    return %arg0, %c0_i32, %arg1 : i32, i32, i32
  }
  func.func @transform_1(%arg0: i32, %arg1: i32) -> (i32, i32) {
    %c0_i32 = arith.constant 0 : i32
    %c0_i32_0 = arith.constant 0 : i32
    %c0_i32_1 = arith.constant 0 : i32
    return %c0_i32, %c0_i32_0 : i32, i32
  }
  func.func @transform_2(%arg0: i32, %arg1: i32) -> (i32, i32) {
    %c0_i32 = arith.constant 0 : i32
    %c0_i32_0 = arith.constant 0 : i32
    %c0_i32_1 = arith.constant 0 : i32
    return %c0_i32, %c0_i32_0 : i32, i32
  }
  func.func @transform_3(%arg0: i32, %arg1: i32) -> (i32, i32, i32) {
    %c0_i32 = arith.constant 0 : i32
    %c0_i32_0 = arith.constant 0 : i32
    return %arg0, %c0_i32, %arg1 : i32, i32, i32
  }
}

</mosaic_0001>

<bundles_post_ra>
// kernel: tpu_custom_call.1
= control target key start
LH: loop header
LB: loop body
LE: loop exit
PB: predicated region body
PF: predicated region fallthrough
CT: control target
= control target key end

     0   :  { %v624_v3 = vmov 0   ;;  %vm194_vm0 = vcmask 785408   ;;  %vm356_vm1 = vcmask 130048   ;;  %s1136_s0 = inlined_call_operand.vmem [shape: f32[2,96,16], index: 0, kind: input, shape index: {}]   ;;  %s1137_s2 = inlined_call_operand.vmem [shape: f32[192,1], index: 2, kind: input, shape index: {}]   ;;  %s1138_s1 = inlined_call_operand.vmem [shape: f32[192,96], index: 1, kind: input, shape index: {}]   ;;  %s1139_s3 = inlined_call_operand.vmem [shape: f32[2,192,16], index: 3, kind: output, shape index: {}]  }
   0x1   :  { %v73_v0 = vld [vmem:[%s1136_s0 + $0x58] sm:$0xff]  ;;  %v72_v2 = vld [vmem:[%s1136_s0 + $0x50] sm:$0xff]  ;;  %621 = vset.pattern.permute.xlu0 %v624_v3  ;;  %622 = vset.pattern.permute.xlu1 %v624_v3  ;;  %v71_v5 = vld [vmem:[%s1136_s0 + $0x48] sm:$0xff] }
   0x2   :  { %v547_v1 = vld [vmem:[%s1136_s0 + $0xb8] sm:$0xff]  ;;  %271 = vmatpush.msra.mxu0 %v73_v0  ;;  %596 = vmatpush.msra.mxu2 %v73_v0  ;;  %v546_v4 = vld [vmem:[%s1136_s0 + $0xb0] sm:$0xff]  ;;  %v545_v6 = vld [vmem:[%s1136_s0 + $0xa8] sm:$0xff] }
   0x3   :  { %398 = vmatpush.msra.mxu1 %v547_v1  ;;  %608 = vmatpush.msra.mxu3 %v547_v1  ;;  %v70_v7 = vld [vmem:[%s1136_s0 + $0x40] sm:$0xff]  ;;  %v69_v10 = vld [vmem:[%s1136_s0 + $0x38] sm:$0xff]  ;;  %v68_v12 = vld [vmem:[%s1136_s0 + $0x30] sm:$0xff] }
   0x4   :  { %272 = vmatpush.msra.mxu0 %v72_v2  ;;  %597 = vmatpush.msra.mxu2 %v72_v2  ;;  %v544_v8 = vld [vmem:[%s1136_s0 + $0xa0] sm:$0xff]  ;;  %v543_v11 = vld [vmem:[%s1136_s0 + $0x98] sm:$0xff]  ;;  %v542_v13 = vld [vmem:[%s1136_s0 + $0x90] sm:$0xff] }
   0x5   :  { %399 = vmatpush.msra.mxu1 %v546_v4  ;;  %609 = vmatpush.msra.mxu3 %v546_v4  ;;  %v38_v9 = vld [vmem:[%s1137_s2] sm:$0xff]  ;;  %v67_v14 = vld [vmem:[%s1136_s0 + $0x28] sm:$0xff]  ;;  %v40_v18 = vld [vmem:[%s1137_s2 + $0x10] sm:$0xff] }
   0x6   :  { %273 = vmatpush.msra.mxu0 %v71_v5  ;;  %598 = vmatpush.msra.mxu2 %v71_v5  ;;  %v541_v15 = vld [vmem:[%s1136_s0 + $0x88] sm:$0xff]  ;;  %v66_v16 = vld [vmem:[%s1136_s0 + $0x20] sm:$0xff]  ;;  %v65_v20 = vld [vmem:[%s1136_s0 + $0x18] sm:$0xff] }
   0x7   :  { %400 = vmatpush.msra.mxu1 %v545_v6  ;;  %610 = vmatpush.msra.mxu3 %v545_v6  ;;  %v540_v17 = vld [vmem:[%s1136_s0 + $0x80] sm:$0xff]  ;;  %v39_v19 = vld [vmem:[%s1137_s2 + $0x8] sm:$0xff]  ;;  %v539_v21 = vld [vmem:[%s1136_s0 + $0x78] sm:$0xff] }
   0x8   :  { %274 = vmatpush.msra.mxu0 %v70_v7  ;;  %599 = vmatpush.msra.mxu2 %v70_v7  ;;  %v64_v22 = vld [vmem:[%s1136_s0 + $0x10] sm:$0xff]  ;;  %v63_v24 = vld [vmem:[%s1136_s0 + $0x8] sm:$0xff]  ;;  %v62_v26 = vld [vmem:[%s1136_s0] sm:$0xff] }
   0x9   :  { %401 = vmatpush.msra.mxu1 %v544_v8  ;;  %611 = vmatpush.msra.mxu3 %v544_v8  ;;  %v538_v23 = vld [vmem:[%s1136_s0 + $0x70] sm:$0xff]  ;;  %v537_v25 = vld [vmem:[%s1136_s0 + $0x68] sm:$0xff]  ;;  %v536_v27 = vld [vmem:[%s1136_s0 + $0x60] sm:$0xff] }
   0xa   :  { %76 = vperm.xlu0 %621, %v38_v9   ;;  %275 = vmatpush.msra.mxu0 %v69_v10  ;;  %v14_v28 = vld [vmem:[%s1138_s1] sm:$0xff]  ;;  %v41_v30 = vld [vmem:[%s1137_s2 + $0x18] sm:$0xff]  ;;  %v44_v31 = vld [vmem:[%s1137_s2 + $0x30] sm:$0xff] }
   0xb   :  { %600 = vmatpush.msra.mxu2 %v69_v10  ;;  %402 = vmatpush.msra.mxu1 %v543_v11  ;;  %v26_v29 = vld [vmem:[%s1138_s1 + $0x60] sm:$0xff]  ;;  %v15_v33 = vld [vmem:[%s1138_s1 + $0x8] sm:$0xff]  ;;  %v45_v35 = vld [vmem:[%s1137_s2 + $0x38] sm:$0xff] }
   0xc   :  { %612 = vmatpush.msra.mxu3 %v543_v11  ;;  %276 = vmatpush.msra.mxu0 %v68_v12  ;;  %v42_v32 = vld [vmem:[%s1137_s2 + $0x20] sm:$0xff]  ;;  %v27_v34 = vld [vmem:[%s1138_s1 + $0x68] sm:$0xff]  ;;  %v16_v38 = vld [vmem:[%s1138_s1 + $0x10] sm:$0xff] }
   0xd   :  { %601 = vmatpush.msra.mxu2 %v68_v12  ;;  %403 = vmatpush.msra.mxu1 %v542_v13  ;;  %v47_v36 = vld [vmem:[%s1137_s2 + $0x48] sm:$0xff]  ;;  %v28_v39 = vld [vmem:[%s1138_s1 + $0x70] sm:$0xff]  ;;  %v50_v41 = vld [vmem:[%s1137_s2 + $0x60] sm:$0xff] }
   0xe   :  { %613 = vmatpush.msra.mxu3 %v542_v13  ;;  %277 = vmatpush.msra.mxu0 %v67_v14  ;;  %v43_v37 = vld [vmem:[%s1137_s2 + $0x28] sm:$0xff]  ;;  %v48_v40 = vld [vmem:[%s1137_s2 + $0x50] sm:$0xff]  ;;  %v46_v42 = vld [vmem:[%s1137_s2 + $0x40] sm:$0xff] }
   0xf   :  { %602 = vmatpush.msra.mxu2 %v67_v14  ;;  %404 = vmatpush.msra.mxu1 %v541_v15  ;;  %v17_v43 = vld [vmem:[%s1138_s1 + $0x18] sm:$0xff]  ;;  %v51_v45 = vld [vmem:[%s1137_s2 + $0x68] sm:$0xff]  ;;  %v18_v48 = vld [vmem:[%s1138_s1 + $0x20] sm:$0xff] }
  0x10   :  { %614 = vmatpush.msra.mxu3 %v541_v15  ;;  %278 = vmatpush.msra.mxu0 %v66_v16  ;;  %v29_v44 = vld [vmem:[%s1138_s1 + $0x78] sm:$0xff]  ;;  %v30_v49 = vld [vmem:[%s1138_s1 + $0x80] sm:$0xff]  ;;  %v56_v51 = vld [vmem:[%s1137_s2 + $0x90] sm:$0xff] }
  0x11   :  { %603 = vmatpush.msra.mxu2 %v66_v16  ;;  %405 = vmatpush.msra.mxu1 %v540_v17  ;;  %v53_v46 = vld [vmem:[%s1137_s2 + $0x78] sm:$0xff]  ;;  %v54_v50 = vld [vmem:[%s1137_s2 + $0x80] sm:$0xff]  ;;  %v52_v52 = vld [vmem:[%s1137_s2 + $0x70] sm:$0xff] }
  0x12   :  { %615 = vmatpush.msra.mxu3 %v540_v17  ;;  %86 = vperm.xlu1 %622, %v40_v18   ;;  %v49_v47 = vld [vmem:[%s1137_s2 + $0x58] sm:$0xff]  ;;  %v19_v53 = vld [vmem:[%s1138_s1 + $0x28] sm:$0xff]  ;;  %v20_v58 = vld [vmem:[%s1138_s1 + $0x30] sm:$0xff] }
  0x13   :  { %81 = vperm.xlu0 %621, %v39_v19   ;;  %279 = vmatpush.msra.mxu0 %v65_v20  ;;  %v31_v54 = vld [vmem:[%s1138_s1 + $0x88] sm:$0xff]  ;;  %v57_v55 = vld [vmem:[%s1137_s2 + $0x98] sm:$0xff]  ;;  %v32_v59 = vld [vmem:[%s1138_s1 + $0x90] sm:$0xff] }
  0x14   :  { %604 = vmatpush.msra.mxu2 %v65_v20  ;;  %406 = vmatpush.msra.mxu1 %v539_v21  ;;  %v59_v56 = vld [vmem:[%s1137_s2 + $0xa8] sm:$0xff]  ;;  %v60_v60 = vld [vmem:[%s1137_s2 + $0xb0] sm:$0xff]  ;;  %v58_v61 = vld [vmem:[%s1137_s2 + $0xa0] sm:$0xff] }
  0x15   :  { %616 = vmatpush.msra.mxu3 %v539_v21  ;;  %280 = vmatpush.msra.mxu0 %v64_v22  ;;  %v55_v57 = vld [vmem:[%s1137_s2 + $0x88] sm:$0xff]  ;;  %v21_v62 = vld [vmem:[%s1138_s1 + $0x38] sm:$0xff]  ;;  %v22_v1 = vld [vmem:[%s1138_s1 + $0x40] sm:$0xff] }
  0x16   :  { %605 = vmatpush.msra.mxu2 %v64_v22  ;;  %407 = vmatpush.msra.mxu1 %v538_v23  ;;  %v33_v63 = vld [vmem:[%s1138_s1 + $0x98] sm:$0xff]  ;;  %v34_v2 = vld [vmem:[%s1138_s1 + $0xa0] sm:$0xff]  ;;  %v35_v4 = vld [vmem:[%s1138_s1 + $0xa8] sm:$0xff] }
  0x17   :  { %617 = vmatpush.msra.mxu3 %v538_v23  ;;  %281 = vmatpush.msra.mxu0 %v63_v24  ;;  %v61_v0 = vld [vmem:[%s1137_s2 + $0xb8] sm:$0xff]  ;;  %v24_v5 = vld [vmem:[%s1138_s1 + $0x50] sm:$0xff] }
  0x18   :  { %606 = vmatpush.msra.mxu2 %v63_v24  ;;  %408 = vmatpush.msra.mxu1 %v537_v25  ;;  %v36_v6 = vld [vmem:[%s1138_s1 + $0xb0] sm:$0xff]  ;;  %v25_v7 = vld [vmem:[%s1138_s1 + $0x58] sm:$0xff] }
  0x19   :  { %618 = vmatpush.msra.mxu3 %v537_v25  ;;  %282 = vmatpush.msra.mxu0 %v62_v26  ;;  %v37_v8 = vld [vmem:[%s1138_s1 + $0xb8] sm:$0xff] }
  0x1a   :  { %607 = vmatpush.msra.mxu2 %v62_v26  ;;  %409 = vmatpush.msra.mxu1 %v536_v27 }
  0x1b   :  { %619 = vmatpush.msra.mxu3 %v536_v27  ;;  %512 = vmatmul.msk.f32.vlgmr.msra.gmra.mxu0 %vm194_vm0, %v14_v28 }
  0x1c   :  { %524 = vmatmul.msk.f32.vlgmr.msra.gmra.mxu2 %vm194_vm0, %v26_v29  ;;  %548 = vmatmul.msk.f32.vlgmr.msra.gmra.mxu1 %vm194_vm0, %v14_v28 }
  0x1d   :  { %560 = vmatmul.msk.f32.vlgmr.msra.gmra.mxu3 %vm194_vm0, %v26_v29  ;;  %91 = vperm.xlu1 %622, %v41_v30  }
  0x1e   :  { %106 = vperm.xlu0 %621, %v44_v31   ;;  %623 = vset.pattern.permute.xlu2 %v624_v3  ;;  %v23_v3 = vld [vmem:[%s1138_s1 + $0x48] sm:$0xff] }
  0x1f   :  { %96 = vperm.xlu2 %623, %v42_v32  }
  0x23   :  { %513 = vmatmul.msk.f32.gmra.mxu0 %vm194_vm0, %v15_v33 }
  0x24   :  { %525 = vmatmul.msk.f32.gmra.mxu2 %vm194_vm0, %v27_v34  ;;  %549 = vmatmul.msk.f32.gmra.mxu1 %vm194_vm0, %v15_v33 }
  0x25   :  { %561 = vmatmul.msk.f32.gmra.mxu3 %vm194_vm0, %v27_v34  ;;  %111 = vperm.xlu1 %622, %v45_v35  }
  0x26   :  { %121 = vperm.xlu0 %621, %v47_v36  }
  0x27   :  { %101 = vperm.xlu2 %623, %v43_v37  }
  0x2b   :  { %514 = vmatmul.msk.f32.gmra.mxu0 %vm194_vm0, %v16_v38 }
  0x2c   :  { %526 = vmatmul.msk.f32.gmra.mxu2 %vm194_vm0, %v28_v39  ;;  %550 = vmatmul.msk.f32.gmra.mxu1 %vm194_vm0, %v16_v38 }
  0x2d   :  { %562 = vmatmul.msk.f32.gmra.mxu3 %vm194_vm0, %v28_v39  ;;  %126 = vperm.xlu1 %622, %v48_v40  }
  0x2e   :  { %136 = vperm.xlu0 %621, %v50_v41  }
  0x2f   :  { %116 = vperm.xlu2 %623, %v46_v42  }
  0x33   :  { %515 = vmatmul.msk.f32.gmra.mxu0 %vm194_vm0, %v17_v43 }
  0x34   :  { %527 = vmatmul.msk.f32.gmra.mxu2 %vm194_vm0, %v29_v44  ;;  %551 = vmatmul.msk.f32.gmra.mxu1 %vm194_vm0, %v17_v43 }
  0x35   :  { %563 = vmatmul.msk.f32.gmra.mxu3 %vm194_vm0, %v29_v44  ;;  %141 = vperm.xlu1 %622, %v51_v45  }
  0x36   :  { %151 = vperm.xlu0 %621, %v53_v46  }
  0x37   :  { %131 = vperm.xlu2 %623, %v49_v47  }
  0x3b   :  { %516 = vmatmul.msk.f32.gmra.mxu0 %vm194_vm0, %v18_v48 }
  0x3c   :  { %528 = vmatmul.msk.f32.gmra.mxu2 %vm194_vm0, %v30_v49  ;;  %552 = vmatmul.msk.f32.gmra.mxu1 %vm194_vm0, %v18_v48 }
  0x3d   :  { %564 = vmatmul.msk.f32.gmra.mxu3 %vm194_vm0, %v30_v49  ;;  %156 = vperm.xlu1 %622, %v54_v50  }
  0x3e   :  { %166 = vperm.xlu0 %621, %v56_v51  }
  0x3f   :  { %146 = vperm.xlu2 %623, %v52_v52  }
  0x43   :  { %517 = vmatmul.msk.f32.gmra.mxu0 %vm194_vm0, %v19_v53 }
  0x44   :  { %529 = vmatmul.msk.f32.gmra.mxu2 %vm194_vm0, %v31_v54  ;;  %553 = vmatmul.msk.f32.gmra.mxu1 %vm194_vm0, %v19_v53 }
  0x45   :  { %565 = vmatmul.msk.f32.gmra.mxu3 %vm194_vm0, %v31_v54  ;;  %171 = vperm.xlu1 %622, %v57_v55  }
  0x46   :  { %181 = vperm.xlu0 %621, %v59_v56  }
  0x47   :  { %161 = vperm.xlu2 %623, %v55_v57  }
  0x4b   :  { %518 = vmatmul.msk.f32.gmra.mxu0 %vm194_vm0, %v20_v58 }
  0x4c   :  { %530 = vmatmul.msk.f32.gmra.mxu2 %vm194_vm0, %v32_v59  ;;  %554 = vmatmul.msk.f32.gmra.mxu1 %vm194_vm0, %v20_v58 }
  0x4d   :  { %566 = vmatmul.msk.f32.gmra.mxu3 %vm194_vm0, %v32_v59  ;;  %186 = vperm.xlu1 %622, %v60_v60  }
  0x4f   :  { %176 = vperm.xlu2 %623, %v58_v61  }
  0x53   :  { %519 = vmatmul.msk.f32.gmra.mxu0 %vm194_vm0, %v21_v62 }
  0x54   :  { %531 = vmatmul.msk.f32.gmra.mxu2 %vm194_vm0, %v33_v63  ;;  %555 = vmatmul.msk.f32.gmra.mxu1 %vm194_vm0, %v21_v62 }
  0x55   :  { %567 = vmatmul.msk.f32.gmra.mxu3 %vm194_vm0, %v33_v63 }
  0x57   :  { %191 = vperm.xlu2 %623, %v61_v0  }
  0x5b   :  { %520 = vmatmul.msk.f32.gmra.mxu0 %vm194_vm0, %v22_v1 }
  0x5c   :  { %532 = vmatmul.msk.f32.gmra.mxu2 %vm194_vm0, %v34_v2  ;;  %556 = vmatmul.msk.f32.gmra.mxu1 %vm194_vm0, %v22_v1 }
  0x5d   :  { %568 = vmatmul.msk.f32.gmra.mxu3 %vm194_vm0, %v34_v2 }
  0x63   :  { %521 = vmatmul.msk.f32.gmra.mxu0 %vm194_vm0, %v23_v3 }
  0x64   :  { %533 = vmatmul.msk.f32.gmra.mxu2 %vm194_vm0, %v35_v4  ;;  %557 = vmatmul.msk.f32.gmra.mxu1 %vm194_vm0, %v23_v3 }
  0x65   :  { %569 = vmatmul.msk.f32.gmra.mxu3 %vm194_vm0, %v35_v4 }
  0x6b   :  { %522 = vmatmul.msk.f32.gmra.mxu0 %vm194_vm0, %v24_v5 }
  0x6c   :  { %534 = vmatmul.msk.f32.gmra.mxu2 %vm194_vm0, %v36_v6  ;;  %558 = vmatmul.msk.f32.gmra.mxu1 %vm194_vm0, %v24_v5 }
  0x6d   :  { %570 = vmatmul.msk.f32.gmra.mxu3 %vm194_vm0, %v36_v6 }
  0x73   :  { %523 = vmatmul.msk.f32.gmra.mxu0 %vm194_vm0, %v25_v7 }
  0x74   :  { %535 = vmatmul.msk.f32.gmra.mxu2 %vm194_vm0, %v37_v8  ;;  %559 = vmatmul.msk.f32.gmra.mxu1 %vm194_vm0, %v25_v7 }
  0x75   :  { %571 = vmatmul.msk.f32.gmra.mxu3 %vm194_vm0, %v37_v8 }
  0x79   :  { %v912_v12 = vpop.permute.xlu2 %96 }
  0x7c   :  { %v77_v9 = vpop.permute.xlu0 %76 }
  0x81   :  { %v916_v15 = vpop.permute.xlu2 %101 }
  0x84   :  { %v87_v10 = vpop.permute.xlu1 %86 }
  0x85   :  { %v82_v11 = vpop.permute.xlu0 %81 }
  0x89   :  { %v922_v22 = vpop.permute.xlu2 %116 }
  0x8f   :  { %v92_v13 = vpop.permute.xlu1 %91 }
  0x90   :  { %v914_v14 = vpop.permute.xlu0 %106 }
  0x91   :  { %v942_v33 = vpop.permute.xlu2 %131 }
  0x97   :  { %v918_v16 = vpop.permute.xlu1 %111 }
  0x98   :  { %v920_v17 = vpop.permute.xlu0 %121  ;;  %v284_v18 = vpop.f32.mrf.mxu0 }
  0x99   :  { %v285_v19 = vadd.f32 %v284_v18, %v77_v9  ;;  %v411_v20 = vpop.f32.mrf.mxu1  ;;  %v147_v43 = vpop.permute.xlu2 %146 }
  0x9a   :  { %v412_v21 = vadd.f32 %v411_v20, %v77_v9 }
  0x9b   :  { %357 = vst.msk [vmem:[%s1139_s3] sm:$0xff] %vm356_vm1, %v285_v19 }
  0x9c   :  { %572 = vst.msk [vmem:[%s1139_s3 + $0xc0] sm:$0xff] %vm356_vm1, %v412_v21 }
  0x9f   :  { %v932_v23 = vpop.permute.xlu1 %126  ;;  %v320_v24 = vpop.f32.mrf.mxu2 }
  0xa0   :  { %v137_v25 = vpop.permute.xlu0 %136  ;;  %v447_v26 = vpop.f32.mrf.mxu3 }
  0xa1   :  { %v321_v27 = vadd.f32 %v320_v24, %v137_v25  ;;  %v448_v28 = vadd.f32 %v447_v26, %v137_v25  ;;  %v287_v29 = vpop.f32.mrf.mxu0  ;;  %v414_v30 = vpop.f32.mrf.mxu1 }
  0xa2   :  { %v288_v31 = vadd.f32 %v287_v29, %v82_v11  ;;  %v415_v32 = vadd.f32 %v414_v30, %v82_v11  ;;  %v162_v6 = vpop.permute.xlu2 %161 }
  0xa3   :  { %369 = vst.msk [vmem:[%s1139_s3 + $0x60] sm:$0xff] %vm356_vm1, %v321_v27 }
  0xa4   :  { %584 = vst.msk [vmem:[%s1139_s3 + $0x120] sm:$0xff] %vm356_vm1, %v448_v28 }
  0xa5   :  { %358 = vst.msk [vmem:[%s1139_s3 + $0x8] sm:$0xff] %vm356_vm1, %v288_v31 }
  0xa6   :  { %573 = vst.msk [vmem:[%s1139_s3 + $0xc8] sm:$0xff] %vm356_vm1, %v415_v32 }
  0xa7   :  { %v142_v34 = vpop.permute.xlu1 %141  ;;  %v323_v35 = vpop.f32.mrf.mxu2 }
  0xa8   :  { %v324_v36 = vadd.f32 %v323_v35, %v142_v34  ;;  %v450_v37 = vpop.f32.mrf.mxu3  ;;  %v152_v52 = vpop.permute.xlu0 %151 }
  0xa9   :  { %v451_v38 = vadd.f32 %v450_v37, %v142_v34  ;;  %v290_v39 = vpop.f32.mrf.mxu0  ;;  %v417_v40 = vpop.f32.mrf.mxu1 }
  0xaa   :  { %370 = vst.msk [vmem:[%s1139_s3 + $0x68] sm:$0xff] %vm356_vm1, %v324_v36  ;;  %v291_v41 = vadd.f32 %v290_v39, %v87_v10  ;;  %v418_v42 = vadd.f32 %v417_v40, %v87_v10  ;;  %v177_v37 = vpop.permute.xlu2 %176 }
  0xab   :  { %585 = vst.msk [vmem:[%s1139_s3 + $0x128] sm:$0xff] %vm356_vm1, %v451_v38 }
  0xac   :  { %359 = vst.msk [vmem:[%s1139_s3 + $0x10] sm:$0xff] %vm356_vm1, %v291_v41 }
  0xad   :  { %574 = vst.msk [vmem:[%s1139_s3 + $0xd0] sm:$0xff] %vm356_vm1, %v418_v42 }
  0xaf   :  { %v326_v44 = vpop.f32.mrf.mxu2  ;;  %v157_v61 = vpop.permute.xlu1 %156 }
  0xb0   :  { %v327_v45 = vadd.f32 %v326_v44, %v147_v43  ;;  %v453_v46 = vpop.f32.mrf.mxu3  ;;  %v167_v18 = vpop.permute.xlu0 %166 }
  0xb1   :  { %v454_v47 = vadd.f32 %v453_v46, %v147_v43  ;;  %v293_v48 = vpop.f32.mrf.mxu0  ;;  %v420_v49 = vpop.f32.mrf.mxu1 }
  0xb2   :  { %371 = vst.msk [vmem:[%s1139_s3 + $0x70] sm:$0xff] %vm356_vm1, %v327_v45  ;;  %v294_v50 = vadd.f32 %v293_v48, %v92_v13  ;;  %v421_v51 = vadd.f32 %v420_v49, %v92_v13 }
  0xb3   :  { %586 = vst.msk [vmem:[%s1139_s3 + $0x130] sm:$0xff] %vm356_vm1, %v454_v47 }
  0xb4   :  { %360 = vst.msk [vmem:[%s1139_s3 + $0x18] sm:$0xff] %vm356_vm1, %v294_v50 }
  0xb5   :  { %575 = vst.msk [vmem:[%s1139_s3 + $0xd8] sm:$0xff] %vm356_vm1, %v421_v51 }
  0xb7   :  { %v329_v53 = vpop.f32.mrf.mxu2  ;;  %v172_v28 = vpop.permute.xlu1 %171 }
  0xb8   :  { %v330_v54 = vadd.f32 %v329_v53, %v152_v52  ;;  %v456_v55 = vpop.f32.mrf.mxu3  ;;  %v182_v45 = vpop.permute.xlu0 %181 }
  0xb9   :  { %v457_v56 = vadd.f32 %v456_v55, %v152_v52  ;;  %v296_v57 = vpop.f32.mrf.mxu0  ;;  %v423_v58 = vpop.f32.mrf.mxu1 }
  0xba   :  { %372 = vst.msk [vmem:[%s1139_s3 + $0x78] sm:$0xff] %vm356_vm1, %v330_v54  ;;  %v297_v59 = vadd.f32 %v296_v57, %v912_v12  ;;  %v424_v60 = vadd.f32 %v423_v58, %v912_v12 }
  0xbb   :  { %587 = vst.msk [vmem:[%s1139_s3 + $0x138] sm:$0xff] %vm356_vm1, %v457_v56 }
  0xbc   :  { %361 = vst.msk [vmem:[%s1139_s3 + $0x20] sm:$0xff] %vm356_vm1, %v297_v59 }
  0xbd   :  { %576 = vst.msk [vmem:[%s1139_s3 + $0xe0] sm:$0xff] %vm356_vm1, %v424_v60 }
  0xbf   :  { %v332_v62 = vpop.f32.mrf.mxu2  ;;  %v187_v53 = vpop.permute.xlu1 %186 }
  0xc0   :  { %v333_v63 = vadd.f32 %v332_v62, %v157_v61  ;;  %v459_v0 = vpop.f32.mrf.mxu3 }
  0xc1   :  { %v460_v1 = vadd.f32 %v459_v0, %v157_v61  ;;  %v299_v2 = vpop.f32.mrf.mxu0  ;;  %v426_v3 = vpop.f32.mrf.mxu1 }
  0xc2   :  { %373 = vst.msk [vmem:[%s1139_s3 + $0x80] sm:$0xff] %vm356_vm1, %v333_v63  ;;  %v300_v4 = vadd.f32 %v299_v2, %v916_v15  ;;  %v427_v5 = vadd.f32 %v426_v3, %v916_v15  ;;  %v192_v61 = vpop.permute.xlu2 %191 }
  0xc3   :  { %588 = vst.msk [vmem:[%s1139_s3 + $0x140] sm:$0xff] %vm356_vm1, %v460_v1 }
  0xc4   :  { %362 = vst.msk [vmem:[%s1139_s3 + $0x28] sm:$0xff] %vm356_vm1, %v300_v4 }
  0xc5   :  { %577 = vst.msk [vmem:[%s1139_s3 + $0xe8] sm:$0xff] %vm356_vm1, %v427_v5 }
  0xc7   :  { %v335_v7 = vpop.f32.mrf.mxu2 }
  0xc8   :  { %v336_v8 = vadd.f32 %v335_v7, %v162_v6  ;;  %v462_v9 = vpop.f32.mrf.mxu3 }
  0xc9   :  { %v463_v10 = vadd.f32 %v462_v9, %v162_v6  ;;  %v302_v11 = vpop.f32.mrf.mxu0  ;;  %v429_v12 = vpop.f32.mrf.mxu1 }
  0xca   :  { %374 = vst.msk [vmem:[%s1139_s3 + $0x88] sm:$0xff] %vm356_vm1, %v336_v8  ;;  %v303_v13 = vadd.f32 %v302_v11, %v914_v14  ;;  %v430_v15 = vadd.f32 %v429_v12, %v914_v14 }
  0xcb   :  { %589 = vst.msk [vmem:[%s1139_s3 + $0x148] sm:$0xff] %vm356_vm1, %v463_v10 }
  0xcc   :  { %363 = vst.msk [vmem:[%s1139_s3 + $0x30] sm:$0xff] %vm356_vm1, %v303_v13 }
  0xcd   :  { %578 = vst.msk [vmem:[%s1139_s3 + $0xf0] sm:$0xff] %vm356_vm1, %v430_v15 }
  0xcf   :  { %v338_v19 = vpop.f32.mrf.mxu2 }
  0xd0   :  { %v339_v20 = vadd.f32 %v338_v19, %v167_v18  ;;  %v465_v21 = vpop.f32.mrf.mxu3 }
  0xd1   :  { %v466_v14 = vadd.f32 %v465_v21, %v167_v18  ;;  %v305_v24 = vpop.f32.mrf.mxu0  ;;  %v432_v25 = vpop.f32.mrf.mxu1 }
  0xd2   :  { %375 = vst.msk [vmem:[%s1139_s3 + $0x90] sm:$0xff] %vm356_vm1, %v339_v20  ;;  %v306_v26 = vadd.f32 %v305_v24, %v918_v16  ;;  %v433_v27 = vadd.f32 %v432_v25, %v918_v16 }
  0xd3   :  { %590 = vst.msk [vmem:[%s1139_s3 + $0x150] sm:$0xff] %vm356_vm1, %v466_v14 }
  0xd4   :  { %364 = vst.msk [vmem:[%s1139_s3 + $0x38] sm:$0xff] %vm356_vm1, %v306_v26 }
  0xd5   :  { %579 = vst.msk [vmem:[%s1139_s3 + $0xf8] sm:$0xff] %vm356_vm1, %v433_v27 }
  0xd7   :  { %v341_v29 = vpop.f32.mrf.mxu2 }
  0xd8   :  { %v342_v30 = vadd.f32 %v341_v29, %v172_v28  ;;  %v468_v31 = vpop.f32.mrf.mxu3 }
  0xd9   :  { %v469_v16 = vadd.f32 %v468_v31, %v172_v28  ;;  %v308_v32 = vpop.f32.mrf.mxu0  ;;  %v435_v34 = vpop.f32.mrf.mxu1 }
  0xda   :  { %376 = vst.msk [vmem:[%s1139_s3 + $0x98] sm:$0xff] %vm356_vm1, %v342_v30  ;;  %v309_v35 = vadd.f32 %v308_v32, %v922_v22  ;;  %v436_v36 = vadd.f32 %v435_v34, %v922_v22 }
  0xdb   :  { %591 = vst.msk [vmem:[%s1139_s3 + $0x158] sm:$0xff] %vm356_vm1, %v469_v16 }
  0xdc   :  { %365 = vst.msk [vmem:[%s1139_s3 + $0x40] sm:$0xff] %vm356_vm1, %v309_v35 }
  0xdd   :  { %580 = vst.msk [vmem:[%s1139_s3 + $0x100] sm:$0xff] %vm356_vm1, %v436_v36 }
  0xdf   :  { %v344_v38 = vpop.f32.mrf.mxu2 }
  0xe0   :  { %v345_v39 = vadd.f32 %v344_v38, %v177_v37  ;;  %v471_v40 = vpop.f32.mrf.mxu3 }
  0xe1   :  { %v472_v22 = vadd.f32 %v471_v40, %v177_v37  ;;  %v311_v41 = vpop.f32.mrf.mxu0  ;;  %v438_v42 = vpop.f32.mrf.mxu1 }
  0xe2   :  { %377 = vst.msk [vmem:[%s1139_s3 + $0xa0] sm:$0xff] %vm356_vm1, %v345_v39  ;;  %v312_v43 = vadd.f32 %v311_v41, %v920_v17  ;;  %v439_v44 = vadd.f32 %v438_v42, %v920_v17 }
  0xe3   :  { %592 = vst.msk [vmem:[%s1139_s3 + $0x160] sm:$0xff] %vm356_vm1, %v472_v22 }
  0xe4   :  { %366 = vst.msk [vmem:[%s1139_s3 + $0x48] sm:$0xff] %vm356_vm1, %v312_v43 }
  0xe5   :  { %581 = vst.msk [vmem:[%s1139_s3 + $0x108] sm:$0xff] %vm356_vm1, %v439_v44 }
  0xe7   :  { %v347_v46 = vpop.f32.mrf.mxu2 }
  0xe8   :  { %v348_v47 = vadd.f32 %v347_v46, %v182_v45  ;;  %v474_v48 = vpop.f32.mrf.mxu3 }
  0xe9   :  { %v475_v17 = vadd.f32 %v474_v48, %v182_v45  ;;  %v314_v49 = vpop.f32.mrf.mxu0  ;;  %v441_v50 = vpop.f32.mrf.mxu1 }
  0xea   :  { %378 = vst.msk [vmem:[%s1139_s3 + $0xa8] sm:$0xff] %vm356_vm1, %v348_v47  ;;  %v315_v51 = vadd.f32 %v314_v49, %v932_v23  ;;  %v442_v52 = vadd.f32 %v441_v50, %v932_v23 }
  0xeb   :  { %593 = vst.msk [vmem:[%s1139_s3 + $0x168] sm:$0xff] %vm356_vm1, %v475_v17 }
  0xec   :  { %367 = vst.msk [vmem:[%s1139_s3 + $0x50] sm:$0xff] %vm356_vm1, %v315_v51 }
  0xed   :  { %582 = vst.msk [vmem:[%s1139_s3 + $0x110] sm:$0xff] %vm356_vm1, %v442_v52 }
  0xef   :  { %v350_v54 = vpop.f32.mrf.mxu2 }
  0xf0   :  { %v351_v55 = vadd.f32 %v350_v54, %v187_v53  ;;  %v477_v56 = vpop.f32.mrf.mxu3 }
  0xf1   :  { %v478_v23 = vadd.f32 %v477_v56, %v187_v53  ;;  %v317_v57 = vpop.f32.mrf.mxu0  ;;  %v444_v58 = vpop.f32.mrf.mxu1 }
  0xf2   :  { %379 = vst.msk [vmem:[%s1139_s3 + $0xb0] sm:$0xff] %vm356_vm1, %v351_v55  ;;  %v318_v59 = vadd.f32 %v317_v57, %v942_v33  ;;  %v445_v60 = vadd.f32 %v444_v58, %v942_v33 }
  0xf3   :  { %594 = vst.msk [vmem:[%s1139_s3 + $0x170] sm:$0xff] %vm356_vm1, %v478_v23 }
  0xf4   :  { %368 = vst.msk [vmem:[%s1139_s3 + $0x58] sm:$0xff] %vm356_vm1, %v318_v59 }
  0xf5   :  { %583 = vst.msk [vmem:[%s1139_s3 + $0x118] sm:$0xff] %vm356_vm1, %v445_v60 }
  0xf7   :  { %v353_v62 = vpop.f32.mrf.mxu2 }
  0xf8   :  { %v354_v63 = vadd.f32 %v353_v62, %v192_v61  ;;  %v480_v0 = vpop.f32.mrf.mxu3 }
  0xf9   :  { %v481_v33 = vadd.f32 %v480_v0, %v192_v61 }
  0xfa   :  { %380 = vst.msk [vmem:[%s1139_s3 + $0xb8] sm:$0xff] %vm356_vm1, %v354_v63 }
  0xfb   :  { %595 = vst.msk [vmem:[%s1139_s3 + $0x178] sm:$0xff] %vm356_vm1, %v481_v33 }

</bundles_post_ra>
